<compile_context>
chip_gen: v7x
topology: tpu7x:2x2x1
jax: 0.10.0
libtpu: 0.0.40
codegen_flags: <defaults>
</compile_context>

<pallas_src>
import jax
import jax.numpy as jnp
from jax.experimental import pallas as pl
from jax.experimental.pallas import tpu as pltpu

# Tiled-path block: 256 sublanes x 1024 lanes of f32 = 1 MiB per block.
_BLOCK_ROWS = 256
_BLOCK_LANES = 1024
_BLOCK_ELEMS = _BLOCK_ROWS * _BLOCK_LANES  # 262144 elements


def _sigmoid_kernel(p_ref, o_ref):
    # sigmoid(x) = 0.5 * (tanh(x/2) + 1): one EUP transcendental, exact.
    x = p_ref[...].astype(jnp.float32)
    o_ref[...] = (0.5 * (jnp.tanh(0.5 * x) + 1.0)).astype(o_ref.dtype)


def _sigmoid_single_block(p2d):
    # Full-extent block: one grid step, one DMA in / one DMA out.
    return pl.pallas_call(
        _sigmoid_kernel,
        out_shape=jax.ShapeDtypeStruct(p2d.shape, p2d.dtype),
    )(p2d)


def _sigmoid_tiled(p2d, n_blocks):
    return pl.pallas_call(
        _sigmoid_kernel,
        out_shape=jax.ShapeDtypeStruct(p2d.shape, p2d.dtype),
        grid=(n_blocks,),
        in_specs=[pl.BlockSpec((_BLOCK_ROWS, _BLOCK_LANES), lambda i: (i, 0))],
        out_specs=pl.BlockSpec((_BLOCK_ROWS, _BLOCK_LANES), lambda i: (i, 0)),
        compiler_params=pltpu.CompilerParams(
            dimension_semantics=("parallel",)),
    )(p2d)


@jax.jit
def net_forward(params, inputs=None):
    """Pallas equivalent of Net.forward: sigmoid(params); `inputs` is ignored."""
    del inputs  # ignored, matching the PyTorch module semantics
    n_var = params.shape[0]

    if n_var <= _BLOCK_ELEMS:
        # Common DTLZ case: a single custom call, no padding, no slicing.
        # (n_var,) -> (1, n_var) reshape is layout-trivial.
        out = _sigmoid_single_block(params.reshape(1, n_var))
        return out.reshape(n_var)

    # Huge parameter vectors: pad up to whole 1 MiB blocks and pipeline.
    # TODO(synk): for repeated training steps, keep params persistently in the
    # padded slab to avoid the per-call pad/slice.
    n_blocks = pl.cdiv(n_var, _BLOCK_ELEMS)  # >= 2 by construction
    padded = n_blocks * _BLOCK_ELEMS
    p2d = jnp.pad(params, (0, padded - n_var)).reshape(
        n_blocks * _BLOCK_ROWS, _BLOCK_LANES)
    out2d = _sigmoid_tiled(p2d, n_blocks)
    return out2d.reshape(padded)[:n_var]


if __name__ == "__main__":
    key = jax.random.PRNGKey(0)

    # Default DTLZ setup: n_var = 2 params, mirroring torch.rand(n_var).
    n_var = 2
    params = jax.random.uniform(key, (n_var,), dtype=jnp.float32)
    dummy_inputs = jnp.zeros((4, 8), dtype=jnp.float32)  # ignored by forward

    out = jax.block_until_ready(net_forward(params, dummy_inputs))
    ref = jax.nn.sigmoid(params)
    assert out.shape == (n_var,)
    assert jnp.allclose(out, ref, atol=1e-5, rtol=1e-5), (out, ref)

    # Mid-size n_var (still single full-extent block; not a multiple of 128).
    n_mid = 1000
    params_mid = jax.random.uniform(
        jax.random.PRNGKey(1), (n_mid,), dtype=jnp.float32)
    out_mid = jax.block_until_ready(net_forward(params_mid))
    assert out_mid.shape == (n_mid,)
    assert jnp.allclose(out_mid, jax.nn.sigmoid(params_mid),
                        atol=1e-5, rtol=1e-5)

    # Exercise the tiled multi-block path (n_var > one 1 MiB block).
    n_big = 2 * _BLOCK_ELEMS + 37
    params_big = jax.random.uniform(
        jax.random.PRNGKey(2), (n_big,), dtype=jnp.float32)
    out_big = jax.block_until_ready(net_forward(params_big))
    assert out_big.shape == (n_big,)
    assert jnp.allclose(out_big, jax.nn.sigmoid(params_big),
                        atol=1e-5, rtol=1e-5)

    print("KERNEL_OK")
</pallas_src>

<mosaic_0001>
module attributes {stable_mosaic.version = 11 : i64} {
  func.func @_sigmoid_kernel(%arg0: memref<1x2xf32, #tpu.memory_space<vmem>>, %arg1: memref<1x2xf32, #tpu.memory_space<vmem>>) attributes {dimension_semantics = [], scalar_prefetch = 0 : i64, scratch_operands = 0 : i64, tpu.core_type = #tpu.core_type<tc>} {
    %c0 = arith.constant 0 : index
    %c0_0 = arith.constant 0 : index
    %0 = vector.load %arg0[%c0, %c0_0] : memref<1x2xf32, #tpu.memory_space<vmem>>, vector<1x2xf32>
    %cst = arith.constant 5.000000e-01 : f32
    %1 = vector.broadcast %cst : f32 to vector<1x2xf32>
    %2 = arith.mulf %1, %0 : vector<1x2xf32>
    %3 = math.tanh %2 : vector<1x2xf32>
    %cst_1 = arith.constant 1.000000e+00 : f32
    %4 = vector.broadcast %cst_1 : f32 to vector<1x2xf32>
    %5 = arith.addf %3, %4 : vector<1x2xf32>
    %cst_2 = arith.constant 5.000000e-01 : f32
    %6 = vector.broadcast %cst_2 : f32 to vector<1x2xf32>
    %7 = arith.mulf %6, %5 : vector<1x2xf32>
    %c0_3 = arith.constant 0 : index
    %c0_4 = arith.constant 0 : index
    %8 = vector.load %arg1[%c0_3, %c0_4] : memref<1x2xf32, #tpu.memory_space<vmem>>, vector<1x2xf32>
    tpu.vector_store %arg1[%c0_3, %c0_4], %7 {strides = array<i32>} : memref<1x2xf32, #tpu.memory_space<vmem>>, vector<1x2xf32>,
    return
  }
}

</mosaic_0001>

<bundles_post_ra>
// kernel: net_forward.1
= control target key start
LH: loop header
LB: loop body
LE: loop exit
PB: predicated region body
PF: predicated region fallthrough
CT: control target
= control target key end

     0   :  { %s83_s0 = inlined_call_operand.vmem [shape: f32[1,2], index: 0, kind: input, shape index: {}]   ;;  %s84_s1 = inlined_call_operand.hbm [shape: f32[1,2], index: 1, kind: output, shape index: {}]  }
   0x1   :  { %v9_v0 = vld [vmem:[%s83_s0] sm:$0x1] }
   0x2   :  { %6 = vsyncpa [#allocation3], 0  ;;  %v10_v1 = vmul.f32 0.5, %v9_v0  ;;  %s57_s8 = smov [#allocation2]   ;;  %vm14_vm0 = vcmask 8192  }
   0x3   :  { %s22_s9 = sshll.u32 %s57_s8, 4  ;;  %s23_s9 = int_to_ptr.vmem [resolvable:$true] %s22_s9 }
   0x4   :  { %31 = vtanh.f32 %v10_v1  ;;  %s33_s10 = scalar_lea.vmem %s23_s9, 16  ;;  %s37_s11 = scalar_lea.vmem %s23_s9, 32 }
   0x5   :  { %p34_p0 = scmp.ne.s32.totalorder %s23_s9, %s33_s10  ;;  %p38_p1 = scmp.lt.s32.totalorder %s23_s9, %s23_s9 }
   0x6   :  { %p39_p2 = scmp.lt.s32.totalorder %s37_s11, %s33_s10 }
   0x8   :  { %p40_p3 = por %p39_p2, %p38_p1 }
   0xa   :  { %p41_p4 = pnand %p40_p3, %p34_p0 }
   0xe   :  { %v32_v2 = vpop.eup %31 }
   0xf   :  { %v12_v3 = vadd.f32 1.0, %v32_v2 }
  0x11   :  { %v13_v4 = vmul.f32 0.5, %v12_v3 }
  0x13   :  { %15 = vst.msk [vmem:[#allocation2] sm:$0x1] %vm14_vm0, %v13_v4 }
  0x14   :  { %44 = shalt.err (!%p41_p4)
}
  0x15   :  { %s45_s13 = scalar_lea.hbm %s84_s1, 16 }
  0x16   :  { %p46_p5 = scmp.ne.s32.totalorder %s84_s1, %s45_s13  ;;  %p49_p6 = scmp.lt.u32.totalorder %s45_s13, %s84_s1 }
  0x18   :  { %p51_p7 = pnand %p49_p6, %p46_p5 }
  0x1a   :  { %54 = shalt.err (!%p51_p7)
}
  0x1b   :  { %25 = dma.vmem_to_hbm [thread:$0]  %s23_s9, 16, %s84_s1, [#allocation3]  }
  0x1c   :  { %55 = dma.done.wait [#allocation3], 16  }
  0x1d   :  { %56 = vsyncadd [#allocation3], 4294967280 }
  0x1e   :  { %29 = vsyncpa [#allocation3], 1 }

</bundles_post_ra>
